<compile_context>
chip_gen: v5e
topology: v5e:2x2
jax: 0.10.0
libtpu: 0.0.40
codegen_flags: <defaults>
</compile_context>

<pallas_src>
import functools
import numpy as np
import jax
import jax.numpy as jnp
from jax.experimental import pallas as pl
from jax.experimental.pallas import tpu as pltpu

BN_EPS = 1e-5
LN_EPS = 1e-5
LANE = 128
# Safe on all generations: v5e/v6e have 128 MiB physical, v7x has 64 MiB.
VMEM_LIMIT = 48 * 1024 * 1024


def _round_up(x, m):
    return ((x + m - 1) // m) * m


def _pick_tile(n, cap):
    """Largest multiple of 128 (<= cap) dividing n; n must be a mult of 128."""
    t = min(cap, n)
    while n % t:
        t -= LANE
    return t


def _row_tiles(m, cap):
    """Row tiling: (padded_rows, tile) with tile % 8 == 0 and tile | padded."""
    tm = min(cap, _round_up(m, 8))
    return _round_up(m, tm), tm


# ----------------------------------------------------------------------------
# Generic row-tiled linear (+ optional fused ReLU)
# ----------------------------------------------------------------------------
def _linear_kernel(x_ref, w_ref, b_ref, o_ref, *, relu):
    y = jnp.dot(x_ref[...], w_ref[...],
                preferred_element_type=jnp.float32) + b_ref[...]
    if relu:
        y = jnp.maximum(y, 0.0)
    o_ref[...] = y


def linear(x, w, b, relu=False, block_m=1024):
    M, K = x.shape
    N = w.shape[1]
    Mp, tm = _row_tiles(M, block_m)
    if Mp != M:
        x = jnp.pad(x, ((0, Mp - M), (0, 0)))
    out = pl.pallas_call(
        functools.partial(_linear_kernel, relu=relu),
        grid=(Mp // tm,),
        in_specs=[
            pl.BlockSpec((tm, K), lambda i: (i, 0)),
            pl.BlockSpec((K, N), lambda i: (0, 0)),
            pl.BlockSpec((1, N), lambda i: (0, 0)),
        ],
        out_specs=pl.BlockSpec((tm, N), lambda i: (i, 0)),
        out_shape=jax.ShapeDtypeStruct((Mp, N), jnp.float32),
        compiler_params=pltpu.CompilerParams(
            dimension_semantics=("parallel",),
            vmem_limit_bytes=VMEM_LIMIT),
    )(x.astype(jnp.float32), w.astype(jnp.float32),
      b.reshape(1, N).astype(jnp.float32))
    return out if Mp == M else out[:M]


# ----------------------------------------------------------------------------
# Trans branch: fused fc0 -> LayerNorm(hc) -> ReLU, lane-dense (hp) output
# ----------------------------------------------------------------------------
def _fc_ln_relu_kernel(x_ref, w_ref, b_ref, lw_ref, lb_ref, o_ref, *, hc, hp):
    y = jnp.dot(x_ref[...], w_ref[...],
                preferred_element_type=jnp.float32) + b_ref[...]
    lane = jax.lax.broadcasted_iota(jnp.int32, (1, hp), 1)
    valid_f = (lane < hc).astype(jnp.float32)
    # Padded lanes of y are exactly zero (zero-padded W columns / bias), so
    # summing over all hp lanes equals summing over the hc real channels.
    mean = jnp.sum(y, axis=-1, keepdims=True) * (1.0 / hc)
    xm = (y - mean) * valid_f
    var = jnp.sum(xm * xm, axis=-1, keepdims=True) * (1.0 / hc)
    out = xm * jax.lax.rsqrt(var + LN_EPS) * lw_ref[...] + lb_ref[...]
    o_ref[...] = jnp.maximum(out, 0.0)          # pad lanes stay exactly zero


def fc_layernorm_relu(x, w_pad, b_pad, lw_pad, lb_pad, hc, block_m=1024):
    M, K = x.shape
    hp = w_pad.shape[1]
    Mp, tm = _row_tiles(M, block_m)
    if Mp != M:
        x = jnp.pad(x, ((0, Mp - M), (0, 0)))
    out = pl.pallas_call(
        functools.partial(_fc_ln_relu_kernel, hc=hc, hp=hp),
        grid=(Mp // tm,),
        in_specs=[
            pl.BlockSpec((tm, K), lambda i: (i, 0)),
            pl.BlockSpec((K, hp), lambda i: (0, 0)),
            pl.BlockSpec((1, hp), lambda i: (0, 0)),
            pl.BlockSpec((1, hp), lambda i: (0, 0)),
            pl.BlockSpec((1, hp), lambda i: (0, 0)),
        ],
        out_specs=pl.BlockSpec((tm, hp), lambda i: (i, 0)),
        out_shape=jax.ShapeDtypeStruct((Mp, hp), jnp.float32),
        compiler_params=pltpu.CompilerParams(
            dimension_semantics=("parallel",),
            vmem_limit_bytes=VMEM_LIMIT),
    )(x.astype(jnp.float32), w_pad, b_pad, lw_pad, lb_pad)
    return out if Mp == M else out[:M]


# ----------------------------------------------------------------------------
# Trans branch: fused SGFormer attention layer
#   attn -> (attn + residual)/2 -> LayerNorm(hc) -> ReLU, all lane-dense.
# ----------------------------------------------------------------------------
def _sg_attn_layer_kernel(x_ref, m_ref, wqkv_ref, lw_ref, lb_ref, o_ref,
                          *, hc, hp):
    x = x_ref[0]                               # (N, hp), pad lanes are zero
    mask = m_ref[0]                            # (N, 1)
    n = x.shape[0]
    n_f = float(n)

    # One fused MXU matmul for Q|K|V (each section zero-padded to hp lanes).
    qkv = jnp.dot(x, wqkv_ref[...], preferred_element_type=jnp.float32)
    q = qkv[:, 0 * hp:1 * hp]
    k = qkv[:, 1 * hp:2 * hp]
    v = qkv[:, 2 * hp:3 * hp]
    v = v * mask                               # vs.masked_fill_(~mask, 0)

    # (1, hp) lane-validity mask (hoisted to one row; broadcast is free).
    lane = jax.lax.broadcasted_iota(jnp.int32, (1, hp), 1)
    valid = lane < hc
    valid_f = valid.astype(jnp.float32)

    # qs[qs==0]=eps / ks[ks==0]=eps only on real (< hc) lanes, so padded
    # lanes stay exactly zero and do not perturb the L2 norms / sums.
    eps = 1e-6
    q = jnp.where(jnp.logical_and(q == 0.0, valid), eps, q)
    k = jnp.where(jnp.logical_and(k == 0.0, valid), eps, k)

    # L2-normalize via rsqrt (EUP) instead of sqrt + divide (VALU).
    q = q * jax.lax.rsqrt(jnp.sum(q * q, axis=-1, keepdims=True))
    k = k * jax.lax.rsqrt(jnp.sum(k * k, axis=-1, keepdims=True))

    if hc < hp:
        # Fold k_sum into the MXU: lane (hp-1) of v_ext is 1.0 for every row
        # (including masked rows, matching the all-ones einsum), so column
        # (hp-1) of kv carries sum_l k[l,:] and q @ kv carries q . k_sum.
        ones_col = (lane == hp - 1).astype(jnp.float32)     # (1, hp)
        v_ext = v + ones_col
        kv = jax.lax.dot_general(k, v_ext, (((0,), (0,)), ((), ())),
                                 preferred_element_type=jnp.float32)
        num_ext = jnp.dot(q, kv, preferred_element_type=jnp.float32)
        denom = jnp.sum(num_ext * ones_col, axis=-1, keepdims=True) + n_f
        num = num_ext + n_f * v
    else:  # no spare lane: fall back to explicit reductions
        kv = jax.lax.dot_general(k, v, (((0,), (0,)), ((), ())),
                                 preferred_element_type=jnp.float32)
        num = jnp.dot(q, kv, preferred_element_type=jnp.float32) + n_f * v
        k_sum = jnp.sum(k, axis=0, keepdims=True)
        denom = jnp.sum(q * k_sum, axis=-1, keepdims=True) + n_f

    # heads == 1 -> mean over heads is identity. Exact divide (parity).
    attn = num / denom

    # Fused epilogue: (attn + residual)/2 -> LayerNorm(hc) -> ReLU.
    h = (attn + x) * 0.5
    h = h * valid_f                            # drop ones-lane / pad lanes
    mean = jnp.sum(h, axis=-1, keepdims=True) * (1.0 / hc)
    xm = (h - mean) * valid_f
    var = jnp.sum(xm * xm, axis=-1, keepdims=True) * (1.0 / hc)
    out = xm * jax.lax.rsqrt(var + LN_EPS) * lw_ref[...] + lb_ref[...]
    o_ref[0] = jnp.maximum(out, 0.0)           # pad lanes stay exactly zero


def sg_attention_layer(x_pad, mask_f, wqkv_pad, ln_w_pad, ln_b_pad, hc):
    # Whole-graph (1, N, hp) blocks: double-buffered VMEM use is roughly
    # 2 * 2 * N * hp * 4 bytes (~1 KiB per node at hp=128), i.e. N up to
    # ~20k within the 48 MiB budget (v7x included).
    # TODO(synk): for larger N, switch to a two-pass N-tiled variant
    #             (pass 1 accumulates kv / k_sum over N-tiles into VMEM
    #             scratch, pass 2 streams N-tiles for num / denom).
    B, N, hp = x_pad.shape
    return pl.pallas_call(
        functools.partial(_sg_attn_layer_kernel, hc=hc, hp=hp),
        grid=(B,),
        in_specs=[
            pl.BlockSpec((1, N, hp), lambda b: (b, 0, 0)),
            pl.BlockSpec((1, N, 1), lambda b: (b, 0, 0)),
            pl.BlockSpec((hp, 3 * hp), lambda b: (0, 0)),
            pl.BlockSpec((1, hp), lambda b: (0, 0)),
            pl.BlockSpec((1, hp), lambda b: (0, 0)),
        ],
        out_specs=pl.BlockSpec((1, N, hp), lambda b: (b, 0, 0)),
        out_shape=jax.ShapeDtypeStruct((B, N, hp), jnp.float32),
        compiler_params=pltpu.CompilerParams(
            dimension_semantics=("parallel",),
            vmem_limit_bytes=VMEM_LIMIT),
    )(x_pad, mask_f, wqkv_pad, ln_w_pad, ln_b_pad)


# ----------------------------------------------------------------------------
# GCN branch: fused  A_hat @ (X @ W')  + bias -> ReLU -> + residual
# ----------------------------------------------------------------------------
def _gcn_conv_kernel(a_ref, g_ref, w_ref, b_ref, res_ref, o_ref, acc_ref):
    k = pl.program_id(1)

    @pl.when(k == 0)
    def _():
        acc_ref[...] = jnp.zeros_like(acc_ref)

    # Fused X @ W' for this contraction tile (saves an N x H HBM round trip
    # and one pallas_call per GCN layer); bf16 MXU operands, f32 accumulation.
    xw = jnp.dot(g_ref[...], w_ref[...], preferred_element_type=jnp.float32)
    acc_ref[...] += jnp.dot(a_ref[...], xw.astype(jnp.bfloat16),
                            preferred_element_type=jnp.float32)

    @pl.when(k == pl.num_programs(1) - 1)
    def _():
        h = jnp.maximum(acc_ref[...] + b_ref[...], 0.0)
        o_ref[...] = h + res_ref[...]


def gcn_conv(a_hat_bf16, g, w, b, res, *, block_m=512, block_k=1024):
    """ReLU(A_hat @ (g @ W') + b') + res, with A_hat streamed in bf16."""
    Np, H = g.shape
    tm = _pick_tile(Np, block_m)
    tk = _pick_tile(Np, block_k)
    return pl.pallas_call(
        _gcn_conv_kernel,
        grid=(Np // tm, Np // tk),
        in_specs=[
            pl.BlockSpec((tm, tk), lambda i, k: (i, k)),
            pl.BlockSpec((tk, H), lambda i, k: (k, 0)),
            pl.BlockSpec((H, H), lambda i, k: (0, 0)),
            pl.BlockSpec((1, H), lambda i, k: (0, 0)),
            pl.BlockSpec((tm, H), lambda i, k: (i, 0)),
        ],
        out_specs=pl.BlockSpec((tm, H), lambda i, k: (i, 0)),
        out_shape=jax.ShapeDtypeStruct((Np, H), jnp.float32),
        scratch_shapes=[pltpu.VMEM((tm, H), jnp.float32)],
        compiler_params=pltpu.CompilerParams(
            dimension_semantics=("parallel", "arbitrary"),
            vmem_limit_bytes=VMEM_LIMIT),
    )(a_hat_bf16, g.astype(jnp.float32), w.astype(jnp.float32),
      b.reshape(1, H).astype(jnp.float32), res)


# ----------------------------------------------------------------------------
# Combine (graph_weight mix) + gate MLP fused into one kernel
# ----------------------------------------------------------------------------
def _combine_gate_kernel(x1_ref, x2_ref, w1_ref, b1_ref, w2_ref, b2_ref,
                         xc_ref, gate_ref, *, gw):
    xc = gw * x2_ref[...] + (1.0 - gw) * x1_ref[...]
    xc_ref[...] = xc
    h = jnp.dot(xc, w1_ref[...], preferred_element_type=jnp.float32)
    h = jnp.maximum(h + b1_ref[...], 0.0)
    gate_ref[...] = jnp.sum(h * w2_ref[...], axis=-1, keepdims=True) + b2_ref[...]


def combine_and_gate(x1, x2, w1, b1, w2, b2, gw, block_m=1024):
    M, H = x1.shape
    Hh = w1.shape[1]
    Mp, tm = _row_tiles(M, block_m)
    if Mp != M:
        x1 = jnp.pad(x1, ((0, Mp - M), (0, 0)))
        x2 = jnp.pad(x2, ((0, Mp - M), (0, 0)))
    xc, gate = pl.pallas_call(
        functools.partial(_combine_gate_kernel, gw=gw),
        grid=(Mp // tm,),
        in_specs=[
            pl.BlockSpec((tm, H), lambda i: (i, 0)),
            pl.BlockSpec((tm, H), lambda i: (i, 0)),
            pl.BlockSpec((H, Hh), lambda i: (0, 0)),
            pl.BlockSpec((1, Hh), lambda i: (0, 0)),
            pl.BlockSpec((1, Hh), lambda i: (0, 0)),
            pl.BlockSpec((1, 1), lambda i: (0, 0)),
        ],
        out_specs=[pl.BlockSpec((tm, H), lambda i: (i, 0)),
                   pl.BlockSpec((tm, 1), lambda i: (i, 0))],
        out_shape=(jax.ShapeDtypeStruct((Mp, H), jnp.float32),
                   jax.ShapeDtypeStruct((Mp, 1), jnp.float32)),
        compiler_params=pltpu.CompilerParams(
            dimension_semantics=("parallel",),
            vmem_limit_bytes=VMEM_LIMIT),
    )(x1.astype(jnp.float32), x2.astype(jnp.float32),
      w1.astype(jnp.float32), b1.reshape(1, Hh).astype(jnp.float32),
      w2.reshape(1, Hh).astype(jnp.float32),
      b2.reshape(1, 1).astype(jnp.float32))
    return xc[:M], gate[:M]


# ----------------------------------------------------------------------------
# JAX glue (dense-batch layout, adjacency build, segment pooling)
# ----------------------------------------------------------------------------
def to_dense_batch(x_sorted, batch_sorted, num_graphs, max_nodes):
    counts = jax.ops.segment_sum(jnp.ones_like(batch_sorted), batch_sorted,
                                 num_segments=num_graphs)
    offsets = jnp.concatenate(
        [jnp.zeros((1,), counts.dtype), jnp.cumsum(counts)[:-1]])
    pos = jnp.arange(batch_sorted.shape[0]) - offsets[batch_sorted]
    x_dense = jnp.zeros((num_graphs, max_nodes, x_sorted.shape[1]),
                        x_sorted.dtype).at[batch_sorted, pos].set(x_sorted)
    mask = jnp.zeros((num_graphs, max_nodes),
                     bool).at[batch_sorted, pos].set(True)
    return x_dense, mask, pos


def build_gcn_adj(edge_index, num_nodes, num_nodes_pad):
    # Symmetric-normalized adjacency with self loops (PyG gcn_norm semantics),
    # zero-padded to (num_nodes_pad, num_nodes_pad) for the tiled kernel.
    # TODO(synk): for very large graphs replace this dense O(N^2) adjacency
    #             with a CSR / edge-list scalar-prefetch gather kernel (O(E)).
    row, col = edge_index[0], edge_index[1]
    loop = jnp.arange(num_nodes, dtype=row.dtype)
    row = jnp.concatenate([row, loop])
    col = jnp.concatenate([col, loop])
    deg = jnp.zeros((num_nodes_pad,), jnp.float32).at[col].add(1.0)
    dinv = jnp.where(deg > 0, jax.lax.rsqrt(deg), 0.0)
    norm = dinv[row] * dinv[col]
    a = jnp.zeros((num_nodes_pad, num_nodes_pad),
                  jnp.float32).at[col, row].add(norm)
    # bf16 halves the dominant O(N^2) HBM stream (read once per GCN layer);
    # the matmul still accumulates in f32 inside the kernel.
    return a.astype(jnp.bfloat16)


# ----------------------------------------------------------------------------
# Full SGFormer forward
# ----------------------------------------------------------------------------
def sgformer_forward(params, x, edge_index, batch, num_graphs, max_nodes):
    n_total = x.shape[0]
    hidden = params["fc_w"].shape[0]
    hc = hidden
    hp = _round_up(hc, LANE)
    # BN eval with freshly-initialized running stats (mean=0, var=1, affine
    # weight=1, bias=0): y = x / sqrt(1 + eps) -> folded into the GEMM.
    bn_scale = float(1.0 / np.sqrt(1.0 + BN_EPS))

    # ---------------- trans branch (SGModule), lane-dense at hp ----------------
    indices = jnp.argsort(batch, stable=True)
    batch_sorted = batch[indices]
    rev_perm = jnp.argsort(indices)
    x_sorted = x[indices]
    x_dense, mask, pos = to_dense_batch(x_sorted, batch_sorted,
                                        num_graphs, max_nodes)
    B, N, F_in = x_dense.shape

    def pad_row(v):
        return jnp.zeros((1, hp), jnp.float32).at[:, :hc].set(v)

    w0 = jnp.zeros((F_in, hp), jnp.float32).at[:, :hc].set(params["t_fc0_w"])
    b0 = pad_row(params["t_fc0_b"])
    ln0_w = pad_row(params["t_ln"][0][0])
    ln0_b = pad_row(params["t_ln"][0][1])

    h = fc_layernorm_relu(x_dense.reshape(B * N, F_in), w0, b0,
                          ln0_w, ln0_b, hc).reshape(B, N, hp)
    mask_f = mask.astype(jnp.float32)[..., None]

    for i, (wq, wk, wv) in enumerate(params["t_attn"]):
        wqkv = jnp.zeros((hp, 3 * hp), jnp.float32)
        wqkv = (wqkv.at[:hc, 0 * hp:0 * hp + hc].set(wq)
                     .at[:hc, 1 * hp:1 * hp + hc].set(wk)
                     .at[:hc, 2 * hp:2 * hp + hc].set(wv))
        ln_w = pad_row(params["t_ln"][i + 1][0])
        ln_b = pad_row(params["t_ln"][i + 1][1])
        h = sg_attention_layer(h, mask_f, wqkv, ln_w, ln_b, hc)
    x1 = h[batch_sorted, pos][rev_perm][:, :hc]     # undo dense-batch + sort

    # ---------------- graph branch (GraphModule) ----------------
    n_pad = _round_up(max(n_total, LANE), LANE)
    a_hat = build_gcn_adj(edge_index, n_total, n_pad)          # bf16
    x_pad = jnp.pad(x, ((0, n_pad - n_total), (0, 0)))

    # fc0 -> BN(eval, folded) -> ReLU (fused in the kernel)
    g = linear(x_pad, params["g_fc0_w"] * bn_scale,
               params["g_fc0_b"] * bn_scale, relu=True)
    # NOTE: matches PyTorch GraphModule — residual is always the *initial*
    # projection (last_x is never updated inside the loop).
    last_g = g
    for (w, b) in params["g_convs"]:
        g = gcn_conv(a_hat, g, w * bn_scale, b * bn_scale, last_g)
    x2 = g[:n_total]

    # ---------------- combine + gate (fused) + attentional aggregation -------
    graph_weight = 0.5
    xc, gate = combine_and_gate(x1, x2, params["gate1_w"], params["gate1_b"],
                                params["gate2_w"], params["gate2_b"],
                                graph_weight)

    # TODO(synk): per-graph softmax pooling uses XLA segment ops; irregular
    #             segments have no clean dense-Pallas tiling at this size.
    gate_max = jax.ops.segment_max(gate, batch, num_segments=num_graphs)
    gexp = jnp.exp(gate - gate_max[batch])
    gsum = jax.ops.segment_sum(gexp, batch, num_segments=num_graphs)
    alpha = gexp / (gsum[batch] + 1e-16)
    pooled = jax.ops.segment_sum(alpha * xc, batch, num_segments=num_graphs)

    # final LayerNorm (no affine) + fc
    mean = jnp.mean(pooled, axis=-1, keepdims=True)
    var = jnp.mean((pooled - mean) ** 2, axis=-1, keepdims=True)
    pooled_n = (pooled - mean) / jnp.sqrt(var + LN_EPS)
    return linear(pooled_n, params["fc_w"], params["fc_b"])


# ----------------------------------------------------------------------------
# Deterministic parameter init (shapes follow the PyTorch __init__)
# ----------------------------------------------------------------------------
def _init_linear(key, fan_in, fan_out, bias=True):
    kw, kb = jax.random.split(key)
    bound = 1.0 / np.sqrt(fan_in)
    w = jax.random.uniform(kw, (fan_in, fan_out), jnp.float32, -bound, bound)
    b = (jax.random.uniform(kb, (fan_out,), jnp.float32, -bound, bound)
         if bias else None)
    return w, b


def init_params(key, in_ch, hidden, out_ch, trans_layers=2, gnn_layers=3):
    ki = iter(jax.random.split(key, 32))
    p = {}
    # SGModule
    p["t_fc0_w"], p["t_fc0_b"] = _init_linear(next(ki), in_ch, hidden)
    p["t_ln"] = [(jnp.ones((hidden,), jnp.float32),
                  jnp.zeros((hidden,), jnp.float32))
                 for _ in range(trans_layers + 1)]
    p["t_attn"] = []
    for _ in range(trans_layers):
        wq, _ = _init_linear(next(ki), hidden, hidden, bias=False)
        wk, _ = _init_linear(next(ki), hidden, hidden, bias=False)
        wv, _ = _init_linear(next(ki), hidden, hidden, bias=False)
        p["t_attn"].append((wq, wk, wv))
    # GraphModule
    p["g_fc0_w"], p["g_fc0_b"] = _init_linear(next(ki), in_ch, hidden)
    p["g_convs"] = [_init_linear(next(ki), hidden, hidden)
                    for _ in range(gnn_layers)]
    # gate_nn + final fc
    p["gate1_w"], p["gate1_b"] = _init_linear(next(ki), hidden, hidden // 2)
    p["gate2_w"], p["gate2_b"] = _init_linear(next(ki), hidden // 2, 1)
    p["fc_w"], p["fc_b"] = _init_linear(next(ki), hidden, out_ch)
    return p


# ----------------------------------------------------------------------------
if __name__ == "__main__":
    in_ch, hidden, out_ch = 16, 32, 8
    n_nodes = 12

    batch_np = np.array([0, 1, 0, 0, 1, 0, 0, 1, 0, 0, 1, 0], dtype=np.int32)
    num_graphs = int(batch_np.max()) + 1
    max_nodes = int(np.bincount(batch_np).max())

    src = np.arange(n_nodes)
    dst = (src + 1) % n_nodes
    edge_index_np = np.concatenate(
        [np.stack([src, dst]), np.stack([dst, src])], axis=1).astype(np.int32)

    key = jax.random.PRNGKey(0)
    kx, kp = jax.random.split(key)
    x = jax.random.normal(kx, (n_nodes, in_ch), jnp.float32)
    params = init_params(kp, in_ch, hidden, out_ch)

    out = sgformer_forward(params, x, jnp.asarray(edge_index_np),
                           jnp.asarray(batch_np), num_graphs, max_nodes)
    out = jax.block_until_ready(out)
    assert out.shape == (num_graphs, out_ch)
    assert bool(jnp.all(jnp.isfinite(out)))
    print("KERNEL_OK")
</pallas_src>

<mosaic_0001>
module attributes {stable_mosaic.version = 11 : i64} {
  func.func @_fc_ln_relu_kernel(%arg0: i32, %arg1: memref<16x16xf32, #tpu.memory_space<vmem>>, %arg2: memref<16x128xf32, #tpu.memory_space<vmem>>, %arg3: memref<1x128xf32, #tpu.memory_space<vmem>>, %arg4: memref<1x128xf32, #tpu.memory_space<vmem>>, %arg5: memref<1x128xf32, #tpu.memory_space<vmem>>, %arg6: memref<16x128xf32, #tpu.memory_space<vmem>>) attributes {dimension_semantics = [#tpu.dimension_semantics<parallel>], iteration_bounds = array<i64: 1>, scalar_prefetch = 0 : i64, scratch_operands = 0 : i64, tpu.core_type = #tpu.core_type<tc>, window_params = [{transform_indices = @transform_0, window_bounds = array<i64: 16, 16>}, {pipeline_mode = #tpu.pipeline_mode<synchronous>, transform_indices = @transform_1, window_bounds = array<i64: 16, 128>}, {pipeline_mode = #tpu.pipeline_mode<synchronous>, transform_indices = @transform_2, window_bounds = array<i64: 1, 128>}, {pipeline_mode = #tpu.pipeline_mode<synchronous>, transform_indices = @transform_3, window_bounds = array<i64: 1, 128>}, {pipeline_mode = #tpu.pipeline_mode<synchronous>, transform_indices = @transform_4, window_bounds = array<i64: 1, 128>}, {transform_indices = @transform_5, window_bounds = array<i64: 16, 128>}]} {
    %c0 = arith.constant 0 : index
    %c0_0 = arith.constant 0 : index
    %0 = vector.load %arg1[%c0, %c0_0] : memref<16x16xf32, #tpu.memory_space<vmem>>, vector<16x16xf32>
    %c0_1 = arith.constant 0 : index
    %c0_2 = arith.constant 0 : index
    %1 = vector.load %arg2[%c0_1, %c0_2] : memref<16x128xf32, #tpu.memory_space<vmem>>, vector<16x128xf32>
    %cst = arith.constant dense<0.000000e+00> : vector<16x128xf32>
    %2 = tpu.matmul %0, %1, %cst {dimension_numbers = #tpu.dot_dimension_numbers<[1], [0], [0], [1], [0, 0, 1, 1], [], []>} : vector<16x16xf32>, vector<16x128xf32>, vector<16x128xf32> -> vector<16x128xf32>
    %c0_3 = arith.constant 0 : index
    %c0_4 = arith.constant 0 : index
    %3 = vector.load %arg3[%c0_3, %c0_4] : memref<1x128xf32, #tpu.memory_space<vmem>>, vector<1x128xf32>
    %4 = vector.broadcast %3 : vector<1x128xf32> to vector<16x128xf32>
    %5 = arith.addf %2, %4 : vector<16x128xf32>
    %6 = tpu.iota {dimensions = array<i32: 1>} : vector<1x128xi32>
    %c32_i32 = arith.constant 32 : i32
    %7 = vector.broadcast %c32_i32 : i32 to vector<1x128xi32>
    %8 = arith.cmpi slt, %6, %7 : vector<1x128xi32>
    %9 = arith.extui %8 : vector<1x128xi1> to vector<1x128xi32>
    %10 = arith.sitofp %9 : vector<1x128xi32> to vector<1x128xf32>
    %cst_5 = arith.constant dense<0.000000e+00> : vector<16xf32>
    %11 = vector.multi_reduction <add>, %5, %cst_5 [1] : vector<16x128xf32> to vector<16xf32>
    %12 = vector.shape_cast %11 : vector<16xf32> to vector<16x1xf32>
    %cst_6 = arith.constant 3.125000e-02 : f32
    %13 = vector.broadcast %cst_6 : f32 to vector<16x1xf32>
    %14 = arith.mulf %12, %13 : vector<16x1xf32>
    %15 = vector.broadcast %14 : vector<16x1xf32> to vector<16x128xf32>
    %16 = arith.subf %5, %15 : vector<16x128xf32>
    %17 = vector.broadcast %10 : vector<1x128xf32> to vector<16x128xf32>
    %18 = arith.mulf %16, %17 : vector<16x128xf32>
    %19 = arith.mulf %18, %18 : vector<16x128xf32>
    %cst_7 = arith.constant dense<0.000000e+00> : vector<16xf32>
    %20 = vector.multi_reduction <add>, %19, %cst_7 [1] : vector<16x128xf32> to vector<16xf32>
    %21 = vector.shape_cast %20 : vector<16xf32> to vector<16x1xf32>
    %cst_8 = arith.constant 3.125000e-02 : f32
    %22 = vector.broadcast %cst_8 : f32 to vector<16x1xf32>
    %23 = arith.mulf %21, %22 : vector<16x1xf32>
    %cst_9 = arith.constant 9.99999974E-6 : f32
    %24 = vector.broadcast %cst_9 : f32 to vector<16x1xf32>
    %25 = arith.addf %23, %24 : vector<16x1xf32>
    %26 = math.rsqrt %25 : vector<16x1xf32>
    %27 = vector.broadcast %26 : vector<16x1xf32> to vector<16x128xf32>
    %28 = arith.mulf %18, %27 : vector<16x128xf32>
    %c0_10 = arith.constant 0 : index
    %c0_11 = arith.constant 0 : index
    %29 = vector.load %arg4[%c0_10, %c0_11] : memref<1x128xf32, #tpu.memory_space<vmem>>, vector<1x128xf32>
    %30 = vector.broadcast %29 : vector<1x128xf32> to vector<16x128xf32>
    %31 = arith.mulf %28, %30 : vector<16x128xf32>
    %c0_12 = arith.constant 0 : index
    %c0_13 = arith.constant 0 : index
    %32 = vector.load %arg5[%c0_12, %c0_13] : memref<1x128xf32, #tpu.memory_space<vmem>>, vector<1x128xf32>
    %33 = vector.broadcast %32 : vector<1x128xf32> to vector<16x128xf32>
    %34 = arith.addf %31, %33 : vector<16x128xf32>
    %cst_14 = arith.constant 0.000000e+00 : f32
    %35 = vector.broadcast %cst_14 : f32 to vector<16x128xf32>
    %36 = arith.maximumf %34, %35 : vector<16x128xf32>
    %c0_15 = arith.constant 0 : index
    %c0_16 = arith.constant 0 : index
    %37 = vector.load %arg6[%c0_15, %c0_16] : memref<16x128xf32, #tpu.memory_space<vmem>>, vector<16x128xf32>
    tpu.vector_store %arg6[%c0_15, %c0_16], %36 {strides = array<i32>} : memref<16x128xf32, #tpu.memory_space<vmem>>, vector<16x128xf32>,
    return
  }
  func.func @transform_0(%arg0: i32) -> (i32, i32) {
    %c0_i32 = arith.constant 0 : i32
    %c0_i32_0 = arith.constant 0 : i32
    return %arg0, %c0_i32 : i32, i32
  }
  func.func @transform_1(%arg0: i32) -> (i32, i32) {
    %c0_i32 = arith.constant 0 : i32
    %c0_i32_0 = arith.constant 0 : i32
    %c0_i32_1 = arith.constant 0 : i32
    return %c0_i32, %c0_i32_0 : i32, i32
  }
  func.func @transform_2(%arg0: i32) -> (i32, i32) {
    %c0_i32 = arith.constant 0 : i32
    %c0_i32_0 = arith.constant 0 : i32
    %c0_i32_1 = arith.constant 0 : i32
    return %c0_i32, %c0_i32_0 : i32, i32
  }
  func.func @transform_3(%arg0: i32) -> (i32, i32) {
    %c0_i32 = arith.constant 0 : i32
    %c0_i32_0 = arith.constant 0 : i32
    %c0_i32_1 = arith.constant 0 : i32
    return %c0_i32, %c0_i32_0 : i32, i32
  }
  func.func @transform_4(%arg0: i32) -> (i32, i32) {
    %c0_i32 = arith.constant 0 : i32
    %c0_i32_0 = arith.constant 0 : i32
    %c0_i32_1 = arith.constant 0 : i32
    return %c0_i32, %c0_i32_0 : i32, i32
  }
  func.func @transform_5(%arg0: i32) -> (i32, i32) {
    %c0_i32 = arith.constant 0 : i32
    %c0_i32_0 = arith.constant 0 : i32
    return %arg0, %c0_i32 : i32, i32
  }
}

</mosaic_0001>

<bundles_post_ra>
// kernel: tpu_custom_call.1
= control target key start
LH: loop header
LB: loop body
LE: loop exit
PB: predicated region body
PF: predicated region fallthrough
CT: control target
= control target key end

     0   :  { %10 = vsyncpa [#allocation3], 0  ;;  %s333_s0 = inlined_call_operand.hbm [shape: f32[16,16], index: 0, kind: input, shape index: {}]   ;;  %s334_s1 = inlined_call_operand.hbm [shape: f32[16,128], index: 1, kind: input, shape index: {}]   ;;  %s335_s2 = inlined_call_operand.vmem [shape: f32[1,128], index: 2, kind: input, shape index: {}]   ;;  %s336_s3 = inlined_call_operand.vmem [shape: f32[1,128], index: 3, kind: input, shape index: {}]   ;;  %s337_s4 = inlined_call_operand.vmem [shape: f32[1,128], index: 4, kind: input, shape index: {}]   ;;  %s338_s5 = inlined_call_operand.hbm [shape: f32[16,128], index: 5, kind: output, shape index: {}]  }
   0x1   :  { %11 = vsyncpa [#allocation6], 0 }
   0x2   :  { %12 = vsyncpa [#allocation4], 0  ;;  %s17_s20 = sshll.u32 %s333_s0, 4  ;;  %s270_s21 = smov [#allocation2]   ;;  %s18_s20 = int_to_ptr.hbm [resolvable:$true] %s17_s20 }
   0x3   :  { %s19_s22 = sshll.u32 %s270_s21, 4  ;;  %s30_s25 = sshll.u32 %s334_s1, 4  ;;  %s20_s22 = int_to_ptr.vmem [resolvable:$true] %s19_s22  ;;  %s31_s25 = int_to_ptr.hbm [resolvable:$true] %s30_s25 }
   0x4   :  { %s271_s26 = smov 128   ;;  %s272_s27 = smov 8  }
   0x5   :  { %25 = dma.hbm_to_vmem [thread:$0]  %s18_s20, 256, %s20_s22, [#allocation3], %s271_s26, %s271_s26, %s272_s27  }
   0x6   :  { %s273_s28 = smov [#allocation5]  }
   0x7   :  { %s32_s29 = sshll.u32 %s273_s28, 4  ;;  %s33_s29 = int_to_ptr.vmem [resolvable:$true] %s32_s29 }
   0x8   :  { %38 = dma.hbm_to_vmem [thread:$0]  %s31_s25, 256, %s33_s29, [#allocation6], %s271_s26, %s271_s26, %s272_s27  }
   0x9   :  { %264 = dma.done.wait [#allocation3], 256  }
   0xa   :  { %265 = vsyncadd [#allocation3], 4294967040 }
   0xb   :  { %266 = dma.done.wait [#allocation6], 256  }
   0xc   :  { %267 = vsyncadd [#allocation6], 4294967040  ;;  %v56_v0 = vld [vmem:[#allocation5 + $0x8] sm:$0xff]  ;;  %v55_v1 = vld [vmem:[#allocation5] sm:$0xff]  ;;  %vm61_vm0 = vcmask 130048   ;;  %v91_v9 = vlaneseq  ;;  %v274_v13 = vmov 0.0  }
   0xd   :  { %82 = vmatpush.msra.mxu0 %v56_v0  ;;  %v53_v2 = vld [vmem:[#allocation2] sm:$0xff]  ;;  %177 = vmatpush.msra.mxu1 %v56_v0  ;;  %v54_v3 = vld [vmem:[#allocation2 + $0x8] sm:$0xff]  ;;  %s160_s11 = sshll.u32 %s338_s5, 4  ;;  %s161_s11 = int_to_ptr.hbm [resolvable:$true] %s160_s11 }
   0xe   :  { %v185_v4 = vld [vmem:[%s335_s2] ss:$0 sm:$0xff]  ;;  %v92_v10 = vand.u32 127, %v91_v9 }
   0xf   :  { %83 = vmatpush.msra.mxu0 %v55_v1  ;;  %178 = vmatpush.msra.mxu1 %v55_v1  ;;  %v186_v37 = vld [vmem:[%s336_s3] ss:$0 sm:$0xff]  ;;  %s275_s3 = smov [#allocation7]  }
  0x10   :  { %174 = vmatmul.msk.f32.vlgmr.msra.gmra.mxu0 %vm61_vm0, %v53_v2  ;;  %175 = vmatmul.msk.f32.vlgmr.msra.gmra.mxu1 %vm61_vm0, %v54_v3  ;;  %vm93_vm1 = vcmp.lt.s32.totalorder %v92_v10, 32  ;;  %v187_v41 = vld [vmem:[%s337_s4] ss:$0 sm:$0xff]  ;;  %s158_s8 = sshll.u32 %s275_s3, 4  ;;  %s159_s8 = int_to_ptr.vmem [resolvable:$true] %s158_s8 }
  0x11   :  { %v176_v14 = vsel %vm93_vm1, 1.0, %v274_v13 }
  0x8d   :  { %v85_v5 = vpop.f32.mrf.mxu0  ;;  %v88_v7 = vpop.f32.mrf.mxu1 }
  0x8e   :  { %v86_v6 = vadd.f32 %v185_v4, %v85_v5  ;;  %v89_v8 = vadd.f32 %v185_v4, %v88_v7 }
  0x90   :  { %96 = vadd.xlane.f32.xlu0 %v86_v6 }
  0x98   :  { %98 = vadd.xlane.f32.xlu0 %v89_v8 }
 0x103   :  { %v97_v11 = vpop.xlane.xlu0 %96 }
 0x104   :  { %v100_v12 = vmul.f32 0.03125, %v97_v11 }
 0x106   :  { %v102_v15 = vsub.f32 %v86_v6, %v100_v12 }
 0x108   :  { %v104_v16 = vmul.f32 %v176_v14, %v102_v15 }
 0x10a   :  { %v106_v17 = vmul.f32 %v104_v16, %v104_v16 }
 0x10b   :  { %v99_v18 = vpop.xlane.xlu0 %98 }
 0x10c   :  { %v101_v19 = vmul.f32 0.03125, %v99_v18  ;;  %108 = vadd.xlane.f32.xlu1 %v106_v17 }
 0x10e   :  { %v103_v20 = vsub.f32 %v89_v8, %v101_v19 }
 0x110   :  { %v105_v21 = vmul.f32 %v176_v14, %v103_v20 }
 0x112   :  { %v107_v22 = vmul.f32 %v105_v21, %v105_v21 }
 0x114   :  { %110 = vadd.xlane.f32.xlu1 %v107_v22 }
 0x17f   :  { %v109_v23 = vpop.xlane.xlu1 %108 }
 0x180   :  { %v112_v24 = vmul.f32 0.03125, %v109_v23 }
 0x182   :  { %v114_v25 = vadd.f32 1e-05, %v112_v24 }
 0x184   :  { %188 = vrsqrt.f32 %v114_v25  ;;  %vm122_vm3 = vweird.f32 %v114_v25 }
 0x187   :  { %v111_v26 = vpop.xlane.xlu1 %110 }
 0x188   :  { %v113_v27 = vmul.f32 0.03125, %v111_v26 }
 0x18a   :  { %v189_v28 = vpop.eup %188  ;;  %v115_v29 = vadd.f32 1e-05, %v113_v27 }
 0x18b   :  { %v117_v30 = vmul.f32 %v189_v28, %v114_v25  ;;  %vm123_vm2 = vweird.f32 %v189_v28 }
 0x18c   :  { %190 = vrsqrt.f32 %v115_v29  ;;  %vm124_vm4 = vmor %vm122_vm3, %vm123_vm2  ;;  %vm132_vm6 = vweird.f32 %v115_v29 }
 0x18d   :  { %v118_v31 = vmul.f32 %v189_v28, %v117_v30 }
 0x18f   :  { %v119_v32 = vmul.f32 0.5, %v118_v31 }
 0x191   :  { %v120_v33 = vsub.f32 1.5, %v119_v32 }
 0x192   :  { %v191_v34 = vpop.eup %190 }
 0x193   :  { %v121_v35 = vmul.f32 %v189_v28, %v120_v33  ;;  %v127_v36 = vmul.f32 %v191_v34, %v115_v29  ;;  %vm133_vm5 = vweird.f32 %v191_v34 }
 0x194   :  { %vm134_vm7 = vmor %vm132_vm6, %vm133_vm5 }
 0x195   :  { %v125_v38 = vsel %vm124_vm4, %v189_v28, %v121_v35  ;;  %v128_v39 = vmul.f32 %v191_v34, %v127_v36 }
 0x196   :  { %v136_v40 = vmul.f32 %v125_v38, %v104_v16 }
 0x197   :  { %v129_v42 = vmul.f32 0.5, %v128_v39 }
 0x198   :  { %v142_v43 = vmul.f32 %v186_v37, %v136_v40 }
 0x199   :  { %v130_v44 = vsub.f32 1.5, %v129_v42 }
 0x19a   :  { %v148_v45 = vadd.f32 %v187_v41, %v142_v43 }
 0x19b   :  { %v131_v46 = vmul.f32 %v191_v34, %v130_v44 }
 0x19c   :  { %v150_v47 = vmax.f32 %v148_v45, 0.0 }
 0x19d   :  { %v135_v48 = vsel %vm134_vm7, %v191_v34, %v131_v46 }
 0x19e   :  { %v137_v49 = vmul.f32 %v135_v48, %v105_v21  ;;  %152 = vst [vmem:[#allocation7] sm:$0xff] %v150_v47 }
 0x1a0   :  { %v143_v50 = vmul.f32 %v186_v37, %v137_v49 }
 0x1a2   :  { %v149_v51 = vadd.f32 %v187_v41, %v143_v50 }
 0x1a4   :  { %v151_v52 = vmax.f32 %v149_v51, 0.0 }
 0x1a6   :  { %153 = vst [vmem:[#allocation7 + $0x8] sm:$0xff] %v151_v52 }
 0x1a7   :  { %166 = dma.vmem_to_hbm [thread:$0]  %s159_s8, 256, %s161_s11, [#allocation4], %s271_s26, %s271_s26, %s272_s27  }
 0x1a8   :  { %268 = dma.done.wait [#allocation4], 256  }
 0x1a9   :  { %269 = vsyncadd [#allocation4], 4294967040 }
 0x1aa   :  { %171 = vsyncpa [#allocation3], 1 }
 0x1ab   :  { %172 = vsyncpa [#allocation6], 1 }
 0x1ac   :  { %173 = vsyncpa [#allocation4], 1 }

</bundles_post_ra>
